<compile_context>
chip_gen: v6e
topology: v6e:2x2x1
jax: 0.10.0
libtpu: 0.0.40
codegen_flags: <defaults>
</compile_context>

<pallas_src>
import functools

import jax
import jax.numpy as jnp
from jax.experimental import pallas as pl
from jax.experimental.pallas import tpu as pltpu


LANE = 128      # TPU lane width — output last dim padded to a multiple of this
SUBLANE = 8     # sublane granularity for the batch tile


def _round_up(x, m):
    return ((x + m - 1) // m) * m


def head_kernel(x_ref, w_ref, b_ref, o_ref):
    # One MXU matmul per (batch-tile) grid step, f32 accumulation, broadcast bias.
    acc = jnp.dot(x_ref[...], w_ref[...], preferred_element_type=jnp.float32)
    o_ref[...] = (acc + b_ref[...].astype(jnp.float32)).astype(o_ref.dtype)


def prepare_head_params(weight, bias, compute_dtype=None):
    """One-time (init-time) param prep.

    weight: [O, H] PyTorch nn.Linear layout; bias: [O].
    Returns weight as [H, O_pad] (transposed, class dim zero-padded to a
    multiple of 128 for lane-dense stores) and bias as [1, O_pad].
    """
    O, H = weight.shape
    O_pad = _round_up(O, LANE)
    dtype = compute_dtype if compute_dtype is not None else weight.dtype
    w_hk = jnp.zeros((H, O_pad), dtype).at[:, :O].set(weight.T.astype(dtype))
    b2d = jnp.zeros((1, O_pad), jnp.float32).at[:, :O].set(bias.astype(jnp.float32))
    return w_hk, b2d


@functools.partial(jax.jit, static_argnames=("out_cls_num", "batch_tile"))
def head_forward(x, w_hk, b2d, *, out_cls_num, batch_tile=512):
    """x: [B, H]; w_hk: [H, O_pad] (prepared); b2d: [1, O_pad]. Returns [B, O]."""
    B, H = x.shape
    O_pad = w_hk.shape[1]
    out_dtype = x.dtype

    # Batch tile: big enough to amortize per-step overhead, clamped for tiny B,
    # always a multiple of the 8-row sublane granularity.
    TB = min(batch_tile, _round_up(B, SUBLANE))
    grid = (pl.cdiv(B, TB),)

    if w_hk.dtype != x.dtype:
        x = x.astype(w_hk.dtype)   # optional bf16 compute path (f32 accumulate)

    itemsize = jnp.dtype(x.dtype).itemsize
    cost = pl.CostEstimate(
        flops=2 * B * H * O_pad,
        transcendentals=0,
        bytes_accessed=(B * H + H * O_pad + O_pad) * itemsize
        + B * O_pad * jnp.dtype(out_dtype).itemsize,
    )

    out_padded = pl.pallas_call(
        head_kernel,
        out_shape=jax.ShapeDtypeStruct((B, O_pad), out_dtype),
        grid_spec=pltpu.PrefetchScalarGridSpec(
            num_scalar_prefetch=0,
            grid=grid,
            in_specs=[
                pl.BlockSpec((TB, H), lambda i: (i, 0)),      # x tile, pipelined
                pl.BlockSpec((H, O_pad), lambda i: (0, 0)),   # weight, VMEM-resident
                pl.BlockSpec((1, O_pad), lambda i: (0, 0)),   # bias, VMEM-resident
            ],
            out_specs=pl.BlockSpec((TB, O_pad), lambda i: (i, 0)),
        ),
        compiler_params=pltpu.CompilerParams(
            dimension_semantics=("parallel",)),  # v7x: shard batch tiles over 2 TCs
        cost_estimate=cost,
    )(x, w_hk, b2d)

    # Drop the lane padding on the class dimension.
    return out_padded[:, :out_cls_num]


if __name__ == "__main__":
    # Small shapes consistent with the module: hidden_size=32, output_cls_num=16.
    B, hidden_size, output_cls_num = 8, 32, 16

    key = jax.random.PRNGKey(0)
    kx, kw, kb = jax.random.split(key, 3)

    x = jax.random.normal(kx, (B, hidden_size), dtype=jnp.float32)
    # Deterministic parameter init (mimics nn.Linear's uniform init bounds).
    bound = 1.0 / (hidden_size ** 0.5)
    weight = jax.random.uniform(kw, (output_cls_num, hidden_size),
                                minval=-bound, maxval=bound, dtype=jnp.float32)
    bias = jax.random.uniform(kb, (output_cls_num,),
                              minval=-bound, maxval=bound, dtype=jnp.float32)

    # One-time param prep (transpose + lane padding) — outside the hot path.
    w_hk, b2d = prepare_head_params(weight, bias)

    out = head_forward(x, w_hk, b2d, out_cls_num=output_cls_num)
    jax.block_until_ready(out)

    # Reference check against plain JAX (same semantics as torch F.linear).
    ref = x @ weight.T + bias
    assert out.shape == (B, output_cls_num)
    assert jnp.allclose(out, ref, atol=1e-5, rtol=1e-5)

    print("KERNEL_OK")
</pallas_src>

<mosaic_0001>
module attributes {stable_mosaic.version = 11 : i64} {
  func.func @head_kernel(%arg0: i32, %arg1: memref<8x32xf32, #tpu.memory_space<vmem>>, %arg2: memref<32x128xf32, #tpu.memory_space<vmem>>, %arg3: memref<1x128xf32, #tpu.memory_space<vmem>>, %arg4: memref<8x128xf32, #tpu.memory_space<vmem>>) attributes {dimension_semantics = [#tpu.dimension_semantics<parallel>], iteration_bounds = array<i64: 1>, scalar_prefetch = 0 : i64, scratch_operands = 0 : i64, tpu.core_type = #tpu.core_type<tc>, window_params = [{transform_indices = @transform_0, window_bounds = array<i64: 8, 32>}, {pipeline_mode = #tpu.pipeline_mode<synchronous>, transform_indices = @transform_1, window_bounds = array<i64: 32, 128>}, {pipeline_mode = #tpu.pipeline_mode<synchronous>, transform_indices = @transform_2, window_bounds = array<i64: 1, 128>}, {transform_indices = @transform_3, window_bounds = array<i64: 8, 128>}]} {
    %c0 = arith.constant 0 : index
    %c0_0 = arith.constant 0 : index
    %0 = vector.load %arg1[%c0, %c0_0] : memref<8x32xf32, #tpu.memory_space<vmem>>, vector<8x32xf32>
    %c0_1 = arith.constant 0 : index
    %c0_2 = arith.constant 0 : index
    %1 = vector.load %arg2[%c0_1, %c0_2] : memref<32x128xf32, #tpu.memory_space<vmem>>, vector<32x128xf32>
    %cst = arith.constant dense<0.000000e+00> : vector<8x128xf32>
    %2 = tpu.matmul %0, %1, %cst {dimension_numbers = #tpu.dot_dimension_numbers<[1], [0], [0], [1], [0, 0, 1, 1], [], []>} : vector<8x32xf32>, vector<32x128xf32>, vector<8x128xf32> -> vector<8x128xf32>
    %c0_3 = arith.constant 0 : index
    %c0_4 = arith.constant 0 : index
    %3 = vector.load %arg3[%c0_3, %c0_4] : memref<1x128xf32, #tpu.memory_space<vmem>>, vector<1x128xf32>
    %4 = vector.broadcast %3 : vector<1x128xf32> to vector<8x128xf32>
    %5 = arith.addf %2, %4 : vector<8x128xf32>
    %c0_5 = arith.constant 0 : index
    %c0_6 = arith.constant 0 : index
    %6 = vector.load %arg4[%c0_5, %c0_6] : memref<8x128xf32, #tpu.memory_space<vmem>>, vector<8x128xf32>
    tpu.vector_store %arg4[%c0_5, %c0_6], %5 {strides = array<i32>} : memref<8x128xf32, #tpu.memory_space<vmem>>, vector<8x128xf32>,
    return
  }
  func.func @transform_0(%arg0: i32) -> (i32, i32) {
    %c0_i32 = arith.constant 0 : i32
    %c0_i32_0 = arith.constant 0 : i32
    return %arg0, %c0_i32 : i32, i32
  }
  func.func @transform_1(%arg0: i32) -> (i32, i32) {
    %c0_i32 = arith.constant 0 : i32
    %c0_i32_0 = arith.constant 0 : i32
    %c0_i32_1 = arith.constant 0 : i32
    return %c0_i32, %c0_i32_0 : i32, i32
  }
  func.func @transform_2(%arg0: i32) -> (i32, i32) {
    %c0_i32 = arith.constant 0 : i32
    %c0_i32_0 = arith.constant 0 : i32
    %c0_i32_1 = arith.constant 0 : i32
    return %c0_i32, %c0_i32_0 : i32, i32
  }
  func.func @transform_3(%arg0: i32) -> (i32, i32) {
    %c0_i32 = arith.constant 0 : i32
    %c0_i32_0 = arith.constant 0 : i32
    return %arg0, %c0_i32 : i32, i32
  }
}

</mosaic_0001>

<bundles_post_ra>
// kernel: head_forward.1
= control target key start
LH: loop header
LB: loop body
LE: loop exit
PB: predicated region body
PF: predicated region fallthrough
CT: control target
= control target key end

     0   :  { %8 = vsyncpa [#allocation3], 0  ;;  %s274_s0 = inlined_call_operand.hbm [shape: f32[8,32], index: 0, kind: input, shape index: {}]   ;;  %s275_s1 = inlined_call_operand.hbm [shape: f32[32,128], index: 1, kind: input, shape index: {}]   ;;  %s276_s2 = inlined_call_operand.vmem [shape: f32[1,128], index: 2, kind: input, shape index: {}]   ;;  %s277_s3 = inlined_call_operand.hbm [shape: f32[8,128], index: 3, kind: output, shape index: {}]  }
   0x1   :  { %9 = vsyncpa [#allocation6], 0 }
   0x2   :  { %10 = vsyncpa [#allocation4], 0  ;;  %s235_s12 = smov [#allocation2]   ;;  %s236_s14 = smov [#allocation5]  }
   0x3   :  { %s17_s13 = sshll.u32 %s235_s12, 4  ;;  %s26_s15 = sshll.u32 %s236_s14, 4  ;;  %s18_s13 = int_to_ptr.vmem [resolvable:$true] %s17_s13  ;;  %s27_s15 = int_to_ptr.vmem [resolvable:$true] %s26_s15 }
   0x4   :  { %s177_s16 = scalar_lea.vmem %s18_s13, 128  ;;  %p182_p1 = scmp.lt.s32.totalorder %s18_s13, %s18_s13 }
   0x5   :  { %p178_p0 = scmp.ne.s32.totalorder %s18_s13, %s177_s16  ;;  %p183_p2 = scmp.lt.s32.totalorder %s177_s16, %s177_s16 }
   0x7   :  { %p184_p3 = por %p183_p2, %p182_p1 }
   0x9   :  { %p185_p4 = pnand %p184_p3, %p178_p0 }
   0xb   :  { %188 = shalt.err (!%p185_p4)
}
   0xc   :  { %20 = dma.hbm_to_vmem [thread:$0]  %s274_s0, 128, %s18_s13, [#allocation3]  }
   0xd   :  { %s197_s19 = scalar_lea.vmem %s27_s15, 512  ;;  %p202_p6 = scmp.lt.s32.totalorder %s27_s15, %s27_s15 }
   0xe   :  { %p198_p5 = scmp.ne.s32.totalorder %s27_s15, %s197_s19  ;;  %p203_p7 = scmp.lt.s32.totalorder %s197_s19, %s197_s19 }
  0x10   :  { %p204_p8 = por %p203_p7, %p202_p6 }
  0x12   :  { %p205_p9 = pnand %p204_p8, %p198_p5 }
  0x14   :  { %208 = shalt.err (!%p205_p9)
}
  0x15   :  { %s237_s20 = smov 128   ;;  %s238_s21 = smov 8  }
  0x16   :  { %32 = dma.hbm_to_vmem [thread:$0]  %s275_s1, 512, %s27_s15, [#allocation6], %s237_s20, %s237_s20, %s238_s21  }
  0x17   :  { %229 = dma.done.wait [#allocation3], 128  }
  0x18   :  { %230 = vsyncadd [#allocation3], 4294967168 }
  0x19   :  { %231 = dma.done.wait [#allocation6], 512  }
  0x1a   :  { %232 = vsyncadd [#allocation6], 4294966784  ;;  %v239_v0 = vmov 0.0   ;;  %vm240_vm0 = vmmov 0   ;;  %v45_v1 = vld [vmem:[#allocation5 + $0x18] sm:$0xff]  ;;  %v44_v2 = vld [vmem:[#allocation5 + $0x10] sm:$0xff] }
  0x1b   :  { %151 = vmatprep.subr.mxu0 %v239_v0  ;;  %159 = vmatprep.mubr.msk.f32.mxu0 %vm240_vm0, %v239_v0  ;;  %v43_v3 = vld [vmem:[#allocation5 + $0x8] sm:$0xff]  ;;  %v42_v4 = vld [vmem:[#allocation5] sm:$0xff]  ;;  %v41_v5 = vld [vmem:[#allocation2] sm:$0xff]  ;;  %vm53_vm1 = vcmask 261120   ;;  %s241_s24 = smov [#allocation7]  }
  0x1c   :  { %152 = vmatpush3.msra.mxu0 %v45_v1  ;;  %v144_v6 = vld [vmem:[%s276_s2] ss:$0 sm:$0xff]  ;;  %s134_s25 = sshll.u32 %s241_s24, 4  ;;  %s135_s25 = int_to_ptr.vmem [resolvable:$true] %s134_s25 }
  0x1d   :  { %153 = vmatprep.subr.mxu0 %v239_v0  ;;  %s209_s26 = scalar_lea.vmem %s135_s25, 128  ;;  %p214_p11 = scmp.lt.s32.totalorder %s135_s25, %s135_s25 }
  0x1e   :  { %154 = vmatpush3.msra.mxu0 %v44_v2  ;;  %p210_p10 = scmp.ne.s32.totalorder %s135_s25, %s209_s26  ;;  %p215_p12 = scmp.lt.s32.totalorder %s209_s26, %s209_s26 }
  0x1f   :  { %155 = vmatprep.subr.mxu0 %v239_v0 }
  0x20   :  { %156 = vmatpush3.msra.mxu0 %v43_v3  ;;  %p216_p13 = por %p215_p12, %p214_p11 }
  0x21   :  { %157 = vmatprep.subr.mxu0 %v239_v0 }
  0x22   :  { %158 = vmatpush3.msra.mxu0 %v42_v4  ;;  %p217_p0 = pnand %p216_p13, %p210_p10 }
  0x23   :  { %160 = vmatmul.mubr.msk.f32.vlgmr.msra.gmra.mxu0 %vm53_vm1, %v41_v5 }
  0xe3   :  { %v123_v7 = vpop.f32.mrf.mxu0 }
  0xe4   :  { %v124_v8 = vadd.f32 %v144_v6, %v123_v7 }
  0xe5   :  { %v161_v9 = vpop.f32.mrf.mxu0 }
  0xe6   :  { %127 = vst [vmem:[#allocation7] sm:$0xff] %v124_v8 }
  0xe7   :  { %220 = shalt.err (!%p217_p0)
}
  0xe8   :  { %137 = dma.vmem_to_hbm [thread:$0]  %s135_s25, 128, %s277_s3, [#allocation4]  }
  0xe9   :  { %233 = dma.done.wait [#allocation4], 128  }
  0xea   :  { %234 = vsyncadd [#allocation4], 4294967168 }
  0xeb   :  { %141 = vsyncpa [#allocation3], 1 }
  0xec   :  { %142 = vsyncpa [#allocation6], 1 }
  0xed   :  { %143 = vsyncpa [#allocation4], 1 }

</bundles_post_ra>
